<compile_context>
chip_gen: v6e
topology: v6e:2x2x1
jax: 0.10.0
libtpu: 0.0.40
codegen_flags: <defaults>
</compile_context>

<pallas_src>
import jax
import jax.numpy as jnp
from jax import lax
from jax.experimental import pallas as pl
from jax.experimental.pallas import tpu as pltpu

# ------------------------- sizes (synthetic, small) -------------------------
V = 512                  # TODO(synk): real SMPL V=6890 -> pad to 6912 with zero-weight columns and slice off.
NJ = 24                  # 1 global + 23 body joints
K = 24                   # regressed keypoints (synthetic joints_regressor)
NBETAS = 10
NPOSE = 9 * (NJ - 1)     # 207 pose-blendshape features
G = 3                    # neutral / male / female
GNJ = G * NJ             # 72 — gender-stacked LBS contraction
GK = G * K               # 72 — gender-stacked keypoint columns
NDIRS = 224              # fused dirs rows: 1 + 10 + 207 = 218, padded to 224 (16-aligned for bf16)
PROWS = 16               # per-sample transform rows, 12 padded to 16 (8-aligned sublane merge)
LANE_TILE = 1536         # = 3*V for demo; use 3456/6912/10368 at real SMPL sizes

assert NDIRS >= 1 + NBETAS + NPOSE
assert (3 * V) % LANE_TILE == 0 and LANE_TILE % 128 == 0

PARENTS_PY = [-1, 0, 0, 0, 1, 2, 3, 4, 5, 6, 7, 8, 9, 9, 9, 12, 13, 14, 16, 17, 18, 19, 20, 21]
PARENTS = jnp.array(PARENTS_PY, dtype=jnp.int32)


# ----------------------------- Pallas kernels -------------------------------
def _blend_kernel(coeff_ref, dirs_ref, vposed_ref):
    """K1: fused (template|shape|pose) blendshapes, gender-masked reduction.

    Grid = (lane-tiles, G). G is a reduction axis; coefficients of non-selected
    genders are zero, so accumulating over G yields the per-sample selected
    gender's v_posed.  bf16 operands, f32 accumulation.
    """
    g = pl.program_id(1)
    c = coeff_ref[0]                 # (B, NDIRS)      bf16, gender-masked
    d = dirs_ref[0]                  # (NDIRS, TILE)   bf16
    contrib = jnp.dot(c, d, preferred_element_type=jnp.float32)   # (B, TILE) f32

    @pl.when(g == 0)
    def _():
        vposed_ref[...] = contrib

    @pl.when(g > 0)
    def _():
        vposed_ref[...] += contrib


def _skin_kernel(vposed_ref, pexp_ref, transl_ref, kpmask_ref, skinw_ref, kpw_ref,
                 verts_ref, joints_ref):
    """K2: batched LBS skinning + keypoint regression + transl add.

    Grid = (B/BBLK,).  skin_w (G*NJ, V) and kp_w_t (V, G*K) are bf16 and
    VMEM-resident for the whole grid (constant index_map).  Gender selection
    is encoded as zero blocks in pexp (LBS) and as kpmask (keypoints).
    """
    bblk = vposed_ref.shape[0]
    w = skinw_ref[...].astype(jnp.float32)                          # (GNJ, V)
    p = pexp_ref[...].reshape(bblk * PROWS, GNJ)                    # tile-aligned merge
    t = jnp.dot(p, w, preferred_element_type=jnp.float32)           # (bblk*16, V)
    t = t.reshape(bblk, PROWS, -1)                                  # (bblk, 16, V)

    vx = vposed_ref[:, 0, :]                                        # (bblk, V)
    vy = vposed_ref[:, 1, :]
    vz = vposed_ref[:, 2, :]
    kp = kpw_ref[...].astype(jnp.float32)                           # (V, GK)
    mask = kpmask_ref[:, 0, :]                                      # (bblk, GK)

    for r in range(3):                                              # static unroll
        # blended transform slabs grouped x/y/z/t: rows r, 3+r, 6+r, 9+r
        vr = (t[:, r, :] * vx + t[:, 3 + r, :] * vy
              + t[:, 6 + r, :] * vz + t[:, 9 + r, :])               # (bblk, V)
        jall = jnp.dot(vr, kp, preferred_element_type=jnp.float32) * mask   # (bblk, GK)
        jr = jall[:, 0:K] + jall[:, K:2 * K] + jall[:, 2 * K:3 * K]  # gender fold -> (bblk, K)
        tr = transl_ref[:, r, :]                                    # (bblk, 1)
        verts_ref[:, r, :] = vr + tr
        joints_ref[:, r, :] = jr + tr


# ----------------------------- pallas_call wrappers --------------------------
def blend_vposed(coeff_g, dirs):
    """K1 wrapper. coeff_g: (G, B, NDIRS) bf16 gender-masked, dirs: (G, NDIRS, 3V) bf16."""
    _, B, nd = coeff_g.shape
    v3 = dirs.shape[-1]
    assert nd == NDIRS and v3 == 3 * V
    L = v3 // LANE_TILE
    return pl.pallas_call(
        _blend_kernel,
        out_shape=jax.ShapeDtypeStruct((B, v3), jnp.float32),
        grid_spec=pltpu.PrefetchScalarGridSpec(
            num_scalar_prefetch=0, grid=(L, G),
            in_specs=[
                pl.BlockSpec((1, B, NDIRS), lambda l, g: (g, 0, 0)),
                pl.BlockSpec((1, NDIRS, LANE_TILE), lambda l, g: (g, 0, l)),
            ],
            out_specs=pl.BlockSpec((B, LANE_TILE), lambda l, g: (0, l))),
        # NOTE: at real SMPL sizes with LANE_TILE >= 10368 on v5e, add
        # vmem_limit_bytes=32<<20 here (double-buffered dirs block exceeds the
        # default 16 MiB scoped VMEM on that generation).
        compiler_params=pltpu.CompilerParams(
            dimension_semantics=("parallel", "arbitrary")),
    )(coeff_g, dirs)


def _pick_bblk(B):
    if B <= 32:
        return B
    for cand in (32, 16, 8, 4, 2):
        if B % cand == 0:
            return cand
    return 1


def skin_and_regress(v_posed, p_exp, transl3, kpmask, skin_w, kp_w_t):
    """K2 wrapper: blocked over samples; gendered weights resident in VMEM."""
    B = v_posed.shape[0]
    bblk = _pick_bblk(B)
    nb = B // bblk
    return pl.pallas_call(
        _skin_kernel,
        out_shape=(jax.ShapeDtypeStruct((B, 3, V), jnp.float32),
                   jax.ShapeDtypeStruct((B, 3, K), jnp.float32)),
        grid_spec=pltpu.PrefetchScalarGridSpec(
            num_scalar_prefetch=0, grid=(nb,),
            in_specs=[
                pl.BlockSpec((bblk, 3, V), lambda b: (b, 0, 0)),
                pl.BlockSpec((bblk, PROWS, GNJ), lambda b: (b, 0, 0)),
                pl.BlockSpec((bblk, 3, 1), lambda b: (b, 0, 0)),
                pl.BlockSpec((bblk, 1, GK), lambda b: (b, 0, 0)),
                pl.BlockSpec((GNJ, V), lambda b: (0, 0)),     # resident, all genders
                pl.BlockSpec((V, GK), lambda b: (0, 0)),      # resident, all genders
            ],
            out_specs=[
                pl.BlockSpec((bblk, 3, V), lambda b: (b, 0, 0)),
                pl.BlockSpec((bblk, 3, K), lambda b: (b, 0, 0)),
            ]),
        compiler_params=pltpu.CompilerParams(
            dimension_semantics=("parallel",)),
    )(v_posed, p_exp, transl3, kpmask, skin_w, kp_w_t)


# --------------------------------- JAX glue ----------------------------------
def batch_rodrigues(rot_vecs):
    """Axis-angle -> rotation matrices (matches smplx.batch_rodrigues)."""
    angle = jnp.linalg.norm(rot_vecs + 1e-8, axis=1, keepdims=True)   # (N, 1)
    rot_dir = rot_vecs / angle
    cos = jnp.cos(angle)[:, :, None]
    sin = jnp.sin(angle)[:, :, None]
    rx, ry, rz = rot_dir[:, 0], rot_dir[:, 1], rot_dir[:, 2]
    zeros = jnp.zeros_like(rx)
    kmat = jnp.stack([zeros, -rz, ry, rz, zeros, -rx, -ry, rx, zeros],
                     axis=1).reshape(-1, 3, 3)
    ident = jnp.eye(3, dtype=rot_vecs.dtype)[None]
    return ident + sin * kmat + (1.0 - cos) * jnp.matmul(kmat, kmat)


def rigid_transform(rot_mats, j_rest):
    """Forward kinematics over the 24-joint SMPL tree (selected gender only)."""
    B = j_rest.shape[0]
    rel = j_rest - j_rest[:, PARENTS]
    rel = rel.at[:, 0].set(j_rest[:, 0])
    top = jnp.concatenate([rot_mats, rel[..., None]], axis=-1)        # (B,NJ,3,4)
    bottom = jnp.broadcast_to(jnp.array([0., 0., 0., 1.], jnp.float32),
                              (B, NJ, 1, 4))
    tm = jnp.concatenate([top, bottom], axis=-2)                      # (B,NJ,4,4)
    chain = [tm[:, 0]]
    for i in range(1, NJ):
        chain.append(jnp.matmul(chain[PARENTS_PY[i]], tm[:, i]))
    chain = jnp.stack(chain, axis=1)                                  # (B,NJ,4,4)
    corr = jnp.einsum('bjrc,bjc->bjr', chain[..., :3, :3], j_rest)
    return chain.at[..., :3, 3].set(chain[..., :3, 3] - corr)


def gendered_smpl_forward(params, betas, body_pose, global_orient, transl, gender):
    B = betas.shape[0]
    full_pose = jnp.concatenate([global_orient, body_pose], axis=1)   # (B, 72)
    rot_mats = batch_rodrigues(full_pose.reshape(-1, 3)).reshape(B, NJ, 3, 3)
    ident = jnp.eye(3, dtype=jnp.float32)
    pose_feat = (rot_mats[:, 1:] - ident).reshape(B, NPOSE)

    # gender -> index: -1 neutral / 0 male / 1 female
    sel = jnp.where(gender == -1, 0, jnp.where(gender == 0, 1, 2))
    onehot = (sel[:, None] == jnp.arange(G)[None, :]).astype(jnp.float32)  # (B, G)

    # fused blendshape coefficients [1 | betas | pose_feat | 0-pad], gender-masked
    coeff = jnp.concatenate(
        [jnp.ones((B, 1), jnp.float32), betas, pose_feat,
         jnp.zeros((B, NDIRS - 1 - NBETAS - NPOSE), jnp.float32)], axis=1)     # (B, NDIRS)
    coeff_g = (onehot.T[:, :, None] * coeff[None, :, :]).astype(jnp.bfloat16)  # (G, B, NDIRS)

    # K1: gender-selected v_posed directly (no (G,B,...) intermediate).
    v_posed = blend_vposed(coeff_g, params['dirs']).reshape(B, 3, V)

    # Rest joints for the selected gender via tiny folded joint-blendshapes.
    tmpl_j_sel = params['tmpl_j'][sel]                     # (B, NJ, 3)
    j_sdirs_sel = params['j_shapedirs'][sel]               # (B, NBETAS, NJ, 3)
    j_rest = tmpl_j_sel + jnp.einsum('bn,bnjc->bjc', betas, j_sdirs_sel)

    A = rigid_transform(rot_mats, j_rest)                  # (B, NJ, 4, 4)
    # x/y/z/t-grouped per-joint transform rows: row index = c*3 + r, padded 12->16.
    a12 = jnp.swapaxes(
        A[..., :3, :].transpose(0, 1, 3, 2).reshape(B, NJ, 12), -1, -2)   # (B, 12, NJ)
    a16 = jnp.concatenate([a12, jnp.zeros((B, PROWS - 12, NJ), jnp.float32)], axis=1)
    # expand along the contraction: zero except the selected gender's NJ-block.
    p_exp = (a16[:, :, None, :] * onehot[:, None, :, None]).reshape(B, PROWS, GNJ)

    kpmask = jnp.repeat(onehot, K, axis=1).reshape(B, 1, GK)   # selects gender's K columns
    transl3 = transl.reshape(B, 3, 1)

    # K2: blocked skinning + keypoint regression + transl add.
    # (Adding transl after regression assumes regressor rows sum to 1 — true
    #  for real SMPL J_regressor and for the softmax-normalized synthetic one.)
    verts_cm, joints_cm = skin_and_regress(v_posed, p_exp, transl3, kpmask,
                                           params['skin_w'], params['kp_w_t'])

    vertices = jnp.swapaxes(verts_cm, -1, -2)              # (B, V, 3)
    joints = jnp.swapaxes(joints_cm, -1, -2)               # (B, K, 3)
    # TODO(synk): convert_kps / vertex_joint_selector convention mapping omitted
    # (identity keypoint convention assumed, joint_mask all ones).
    joint_mask = jnp.ones((B, K), dtype=jnp.uint8)
    keypoints = jnp.concatenate(
        [joints, joint_mask[:, :, None].astype(jnp.float32)], axis=-1)
    return dict(global_orient=global_orient, body_pose=body_pose, betas=betas,
                joints=joints, joint_mask=joint_mask, keypoints=keypoints,
                vertices=vertices)


# ----------------------------------- main ------------------------------------
if __name__ == "__main__":
    B = 4
    key = jax.random.PRNGKey(0)
    keys = jax.random.split(key, 12)

    # inputs
    betas = (jax.random.normal(keys[0], (B, NBETAS)) * 0.5).astype(jnp.float32)
    body_pose = (jax.random.normal(keys[1], (B, (NJ - 1) * 3)) * 0.2).astype(jnp.float32)
    global_orient = (jax.random.normal(keys[2], (B, 3)) * 0.2).astype(jnp.float32)
    transl = jax.random.normal(keys[3], (B, 3)).astype(jnp.float32)
    gender = jnp.array([-1, 0, 1, 0], dtype=jnp.int32)   # neutral / male / female / male

    # deterministic synthetic gendered SMPL parameters (no file loading)
    v_template = (jax.random.normal(keys[4], (G, V, 3)) * 0.1).astype(jnp.float32)
    shapedirs = (jax.random.normal(keys[5], (G, V, 3, NBETAS)) * 0.01).astype(jnp.float32)
    posedirs = (jax.random.normal(keys[6], (G, V, 3, NPOSE)) * 0.001).astype(jnp.float32)
    j_regressor = jax.nn.softmax(jax.random.normal(keys[7], (G, NJ, V)) * 2.0, axis=-1).astype(jnp.float32)
    kp_regressor = jax.nn.softmax(jax.random.normal(keys[8], (G, K, V)) * 2.0, axis=-1).astype(jnp.float32)
    lbs_weights = jax.nn.softmax(jax.random.normal(keys[9], (G, V, NJ)) * 2.0, axis=-1).astype(jnp.float32)

    # fused coords-major dirs: rows = [template | shapedirs | posedirs | 0-pad], bf16
    tmpl_cm = v_template.transpose(0, 2, 1).reshape(G, 1, 3 * V)
    shp_cm = shapedirs.transpose(0, 3, 2, 1).reshape(G, NBETAS, 3 * V)
    pos_cm = posedirs.transpose(0, 3, 2, 1).reshape(G, NPOSE, 3 * V)
    dirs = jnp.concatenate(
        [tmpl_cm, shp_cm, pos_cm,
         jnp.zeros((G, NDIRS - 1 - NBETAS - NPOSE, 3 * V), jnp.float32)],
        axis=1).astype(jnp.bfloat16)                                           # (G, NDIRS, 3V)

    params = dict(
        dirs=dirs,
        # rest-joint regression folded into tiny joint-blendshape tensors (f32)
        tmpl_j=jnp.einsum('gjv,gvc->gjc', j_regressor, v_template),            # (G, NJ, 3)
        j_shapedirs=jnp.einsum('gjv,gvcn->gnjc', j_regressor, shapedirs),      # (G, NBETAS, NJ, 3)
        # gendered LBS weights stacked along contraction, bf16, row = g*NJ + j
        skin_w=jnp.swapaxes(lbs_weights, -1, -2).reshape(GNJ, V).astype(jnp.bfloat16),
        # gendered keypoint regressors stacked along output columns, bf16, col = g*K + k
        kp_w_t=kp_regressor.transpose(2, 0, 1).reshape(V, GK).astype(jnp.bfloat16),
    )

    out = gendered_smpl_forward(params, betas, body_pose, global_orient, transl, gender)
    jax.block_until_ready(out['vertices'])
    jax.block_until_ready(out['joints'])
    assert out['vertices'].shape == (B, V, 3)
    assert out['joints'].shape == (B, K, 3)
    assert out['keypoints'].shape == (B, K, 4)
    assert out['joint_mask'].dtype == jnp.uint8
    print("KERNEL_OK")
</pallas_src>

<mosaic_0001>
module attributes {stable_mosaic.version = 11 : i64} {
  func.func @_blend_kernel(%arg0: i32, %arg1: i32, %arg2: memref<1x4x224xbf16, #tpu.memory_space<vmem>>, %arg3: memref<1x224x1536xbf16, #tpu.memory_space<vmem>>, %arg4: memref<4x1536xf32, #tpu.memory_space<vmem>>) attributes {dimension_semantics = [#tpu.dimension_semantics<parallel>, #tpu.dimension_semantics<arbitrary>], iteration_bounds = array<i64: 1, 3>, scalar_prefetch = 0 : i64, scratch_operands = 0 : i64, tpu.core_type = #tpu.core_type<tc>, window_params = [{transform_indices = @transform_0, window_bounds = array<i64: 1, 4, 224>}, {transform_indices = @transform_1, window_bounds = array<i64: 1, 224, 1536>}, {transform_indices = @transform_2, window_bounds = array<i64: 4, 1536>}]} {
    %c0 = arith.constant 0 : index
    %c0_0 = arith.constant 0 : index
    %c0_1 = arith.constant 0 : index
    %0 = vector.load %arg2[%c0, %c0_0, %c0_1] : memref<1x4x224xbf16, #tpu.memory_space<vmem>>, vector<1x4x224xbf16>
    %1 = vector.shape_cast %0 : vector<1x4x224xbf16> to vector<4x224xbf16>
    %c0_2 = arith.constant 0 : index
    %c0_3 = arith.constant 0 : index
    %c0_4 = arith.constant 0 : index
    %2 = vector.load %arg3[%c0_2, %c0_3, %c0_4] : memref<1x224x1536xbf16, #tpu.memory_space<vmem>>, vector<1x224x1536xbf16>
    %3 = vector.shape_cast %2 : vector<1x224x1536xbf16> to vector<224x1536xbf16>
    %cst = arith.constant dense<0.000000e+00> : vector<4x1536xf32>
    %4 = tpu.matmul %1, %3, %cst {dimension_numbers = #tpu.dot_dimension_numbers<[1], [0], [0], [1], [0, 0, 1, 1], [], []>} : vector<4x224xbf16>, vector<224x1536xbf16>, vector<4x1536xf32> -> vector<4x1536xf32>
    %c0_i32 = arith.constant 0 : i32
    %5 = arith.cmpi eq, %arg1, %c0_i32 : i32
    %6 = arith.extui %5 : i1 to i32
    %c0_i32_5 = arith.constant 0 : i32
    %7 = arith.cmpi ne, %6, %c0_i32_5 : i32
    scf.if %7 {
      %c0_8 = arith.constant 0 : index
      %c0_9 = arith.constant 0 : index
      %11 = vector.load %arg4[%c0_8, %c0_9] : memref<4x1536xf32, #tpu.memory_space<vmem>>, vector<4x1536xf32>
      tpu.vector_store %arg4[%c0_8, %c0_9], %4 {strides = array<i32>} : memref<4x1536xf32, #tpu.memory_space<vmem>>, vector<4x1536xf32>,
    } else {
    }
    %c0_i32_6 = arith.constant 0 : i32
    %8 = arith.cmpi sgt, %arg1, %c0_i32_6 : i32
    %9 = arith.extui %8 : i1 to i32
    %c0_i32_7 = arith.constant 0 : i32
    %10 = arith.cmpi ne, %9, %c0_i32_7 : i32
    scf.if %10 {
      %c0_8 = arith.constant 0 : index
      %c0_9 = arith.constant 0 : index
      %11 = vector.load %arg4[%c0_8, %c0_9] : memref<4x1536xf32, #tpu.memory_space<vmem>>, vector<4x1536xf32>
      %12 = arith.addf %11, %4 : vector<4x1536xf32>
      %c0_10 = arith.constant 0 : index
      %c0_11 = arith.constant 0 : index
      %13 = vector.load %arg4[%c0_10, %c0_11] : memref<4x1536xf32, #tpu.memory_space<vmem>>, vector<4x1536xf32>
      tpu.vector_store %arg4[%c0_10, %c0_11], %12 {strides = array<i32>} : memref<4x1536xf32, #tpu.memory_space<vmem>>, vector<4x1536xf32>,
    } else {
    }
    return
  }
  func.func @transform_0(%arg0: i32, %arg1: i32) -> (i32, i32, i32) {
    %c0_i32 = arith.constant 0 : i32
    %c0_i32_0 = arith.constant 0 : i32
    %c0_i32_1 = arith.constant 0 : i32
    return %arg1, %c0_i32, %c0_i32_0 : i32, i32, i32
  }
  func.func @transform_1(%arg0: i32, %arg1: i32) -> (i32, i32, i32) {
    %c0_i32 = arith.constant 0 : i32
    %c0_i32_0 = arith.constant 0 : i32
    return %arg1, %c0_i32, %arg0 : i32, i32, i32
  }
  func.func @transform_2(%arg0: i32, %arg1: i32) -> (i32, i32) {
    %c0_i32 = arith.constant 0 : i32
    %c0_i32_0 = arith.constant 0 : i32
    return %c0_i32, %arg0 : i32, i32
  }
}

</mosaic_0001>

<bundles_post_ra>
// kernel: tpu_custom_call.1
= control target key start
LH: loop header
LB: loop body
LE: loop exit
PB: predicated region body
PF: predicated region fallthrough
CT: control target
= control target key end

     0   :  { %7 = vsyncpa [#allocation3], 0  ;;  %s2674_s0 = inlined_call_operand.hbm [shape: bf16[3,4,224], index: 0, kind: input, shape index: {}]   ;;  %s2675_s1 = inlined_call_operand.hbm [shape: bf16[3,224,1536], index: 1, kind: input, shape index: {}]   ;;  %s2676_s2 = inlined_call_operand.hbm [shape: f32[4,1536], index: 2, kind: output, shape index: {}]  }
   0x1   :  { %9 = vsyncpa [#allocation3 + $0x1], 0 }
   0x2   :  { %10 = vsyncpa [#allocation6], 0 }
   0x3   :  { %12 = vsyncpa [#allocation6 + $0x1], 0 }
   0x4   :  { %13 = vsyncpa [#allocation4], 0  ;;  %s2333_s9 = smov 0   ;;  %s2335_s10 = smov 0  }
   0x5   :  { %s2337_s11 = smov 0   ;;  %s2339_s12 = smov 0  }
   0x6   :  { %s2341_s13 = smov 0   ;;  %s2343_s14 = smov 0  }
   0x7 LB: > { %s1658_s15 = sadd.s32 4294967295, %s2311_s14   ;;  %s28_s16 = sadd.s32 1, %s2307_s13  ;;  %s2311_s14 = sphi %s2343_s14, %s19_s14   ;;  %s2307_s13 = sphi %s2341_s13, %s2686_s13   ;;  %s2303_s12 = sphi %s2339_s12, %s2685_s12   ;;  %s2299_s11 = sphi %s2337_s11, %s2684_s11   ;;  %s2295_s10 = sphi %s2335_s10, %s2683_s10   ;;  %s2291_s9 = sphi %s2333_s9, %s2682_s9  }
   0x8   : > { %p29_p0 = scmp.ge.s32.totalorder %s28_s16, 3  ;;  %s38_s17 = sadd.s32 1, %s2299_s11 }
   0x9   : > { %p45_p1 = scmp.ne.s32.totalorder %s2299_s11, %s2295_s10  ;;  %p46_p2 = scmp.eq.s32.totalorder %s2311_s14, 0 }
   0xa   : > { %s2688_s16 = smov (%p29_p0, %s28_s16), 0  ;;  %p51_p4 = scmp.ne.s32.totalorder %s2295_s10, %s2291_s9 }
   0xb   : > { %p2369_p3 = por %p46_p2, %p45_p1  ;;  %s35_s19 = ssub.s32 %s2307_s13, %s2688_s16 }
   0xc   : > { %p52_p5 = scmp.eq.s32.totalorder %s1658_s15, 0  ;;  %p36_p6 = scmp.eq.s32.totalorder %s35_s19, 0 }
   0xd   : > { %p1867_p8 = scmp.lt.s32.totalorder %s2311_s14, 3  ;;  %s2387_s22 = sand.u32 1, %s2299_s11  }
   0xe   : > { %p2378_p7 = por %p52_p5, %p51_p4  ;;  %s1848_s23 = sshll.u32 %s2307_s13, 6 }
   0xf   : > { %s2384_s21 = scalar_select %p36_p6, %s2299_s11, %s38_s17  }
  0x10   : > { %s1661_s24 = sshll.u32 %s2387_s22, 2  ;;  %s139_s27 = scalar_lea.hbm %s2674_s0, %s1848_s23 }
  0x11   : > { %s133_s28 = scalar_lea.vmem [#allocation2], %s1661_s24  ;;  %p2396_p9 = pnand %p1867_p8, %p2369_p3 }
  0x12   : > { %s141_s29 = sshll.u32 %s133_s28, 4  ;;  %p1665_p10 = scmp.ge.s32.totalorder %s2311_s14, 1  ;;  %s142_s29 = int_to_ptr.vmem [resolvable:$true] %s141_s29 }
  0x13   : > { %p169_p11 = scmp.lt.s32.totalorder %s2311_s14, 4  ;;  %s130_s3 = scalar_lea.sflag [#allocation3], %s2387_s22 }
  0x14   : > { %p2175_p12 = pneg %p2396_p9  ;;  %s2186_s4 = scalar_lea.vmem %s142_s29, 64 }
  0x15   : > { %p2187_p13 = scmp.ne.s32.totalorder %s142_s29, %s2186_s4  ;;  %s2313_s5 = smov [#allocation2]  }
  0x16   : > { %s2191_s6 = sshll.u32 %s2313_s5, 4  ;;  %s2192_s6 = int_to_ptr.vmem [resolvable:$false] %s2191_s6 }
  0x17   : > { %p2189_p0 = pnand %p2187_p13, %p2175_p12  ;;  %s2193_s7 = scalar_lea.vmem %s2192_s6, 128 }
  0x18   : > { %p2194_p2 = scmp.lt.s32.totalorder %s142_s29, %s2192_s6  ;;  %p2195_p3 = scmp.lt.s32.totalorder %s2193_s7, %s2186_s4 }
  0x19   : > { %p2190_p1 = pneg %p2189_p0 }
  0x1a   : > { %p2196_p4 = por %p2195_p3, %p2194_p2 }
  0x1c   : > { %p2197_p5 = pnand %p2196_p4, %p2190_p1 }
  0x1e   : > { %2200 = shalt.err (!%p2197_p5)
}
  0x1f   : > { %1863 = dma.hbm_to_vmem [thread:$0]  (!%p2396_p9), %s139_s27, 64, %s142_s29, %s130_s3  }
  0x20   : > { %p2414_p6 = pnand %p1665_p10, %p169_p11  ;;  %s1849_s9 = smul.u32 1344, %s2387_s22 }
  0x21   : > { %s1850_s17 = smul.u32 21504, %s2307_s13  ;;  %s149_s26 = scalar_lea.sflag [#allocation6], %s2387_s22 }
  0x22   : > { %s152_s24 = scalar_lea.vmem [#allocation5], %s1849_s9  ;;  %s2314_s27 = smov [#allocation5]  }
  0x23   : > { %s160_s23 = scalar_lea.hbm %s2675_s1, %s1850_s17  ;;  %s161_s25 = sshll.u32 %s152_s24, 4  ;;  %s162_s25 = int_to_ptr.vmem [resolvable:$true] %s161_s25 }
  0x24   : > { %s2214_s28 = scalar_lea.vmem %s162_s25, 21504  ;;  %s2219_s29 = sshll.u32 %s2314_s27, 4  ;;  %s2220_s29 = int_to_ptr.vmem [resolvable:$false] %s2219_s29 }
  0x25   : > { %p2215_p8 = scmp.ne.s32.totalorder %s162_s25, %s2214_s28  ;;  %s2221_s3 = scalar_lea.vmem %s2220_s29, 43008 }
  0x26   : > { %p2222_p10 = scmp.lt.s32.totalorder %s162_s25, %s2220_s29  ;;  %p2223_p11 = scmp.lt.s32.totalorder %s2221_s3, %s2214_s28 }
  0x27   : > { %p2217_p13 = pnand %p2215_p8, %p2175_p12 }
  0x28   : > { %p2224_p1 = por %p2223_p11, %p2222_p10 }
  0x29   : > { %p2218_p0 = pneg %p2217_p13 }
  0x2b   : > { %p2225_p2 = pnand %p2224_p1, %p2218_p0 }
  0x2d   : > { %2228 = shalt.err (!%p2225_p2)
}
  0x2e   : > { %s2315_s4 = smov 768   ;;  %s2316_s5 = smov 48  }
  0x2f   : > { %1866 = dma.hbm_to_vmem [thread:$0]  (!%p2396_p9), %s160_s23, 21504, %s162_s25, %s149_s26, %s2315_s4, %s2315_s4, %s2316_s5  }
  0x30   : > { %173 = sbr.rel (%p2414_p6) target bundleno = 460 (0x1cc), region = 28  ;;  %s175_s22 = sand.u32 (!%p2414_p6), 1, %s2295_s10  }
  0x31   : > { %s1666_s6 = sshll.u32 (!%p2414_p6), %s175_s22, 2  ;;  %s176_s7 = scalar_lea.sflag (!%p2414_p6), [#allocation3], %s175_s22 }
  0x32   : > { %s2432_s9 = scalar_lea.vmem (!%p2414_p6), [#allocation2], %s1666_s6 }
  0x35   : > { %2278 = dma.done.wait (%p2378_p7), %s176_s7, 64  }
  0x36   : > { %2280 = vsyncadd (%p2378_p7), %s176_s7, 4294967232  ;;  %s1851_s17 = smul.u32 1344, %s175_s22  ;;  %s185_s18 = scalar_lea.sflag [#allocation6], %s175_s22 }
  0x38   : > { %s2438_s30 = scalar_lea.vmem [#allocation5], %s1851_s17 }
  0x39   : > { %2282 = dma.done.wait (%p2378_p7), %s185_s18, 21504  }
  0x3a   : > { %2284 = vsyncadd (%p2378_p7), %s185_s18, 4294945792  ;;  %v1921_v0 = vld [vmem:[%s2438_s30 + $0x2a4] ss:$48 sps:$4 sm:$0xff]   ;;  %v1923_v1 = vld [vmem:[%s2438_s30 + $0x2ac] ss:$48 sps:$4 sm:$0xff]   ;;  %vm1231_vm0 = vcmask 785408  }
  0x3b   : > { %1235 = vmatprep.subr.bf16.mxu0 %v1921_v0  ;;  %v1925_v2 = vld [vmem:[%s2438_s30 + $0x2a0] ss:$48 sps:$4 sm:$0xff]   ;;  %v1926_v3 = vld [vmem:[%s2438_s30 + $0x2a8] ss:$48 sps:$4 sm:$0xff]   ;;  %1276 = vmatprep.subr.bf16.mxu1 %v1923_v1  ;;  %v1927_v4 = vld [vmem:[%s2438_s30 + $0x244] ss:$48 sps:$4 sm:$0xff]  }
  0x3c   : > { %1236 = vmatpush1.bf16.msra.mxu0 %v1925_v2  ;;  %1277 = vmatpush1.bf16.msra.mxu1 %v1926_v3  ;;  %v1929_v5 = vld [vmem:[%s2438_s30 + $0x24c] ss:$48 sps:$4 sm:$0xff]   ;;  %v1931_v6 = vld [vmem:[%s2438_s30 + $0x240] ss:$48 sps:$4 sm:$0xff]   ;;  %v1932_v7 = vld [vmem:[%s2438_s30 + $0x248] ss:$48 sps:$4 sm:$0xff]  }
  0x3d   : > { %1237 = vmatprep.subr.bf16.mxu0 %v1927_v4  ;;  %1278 = vmatprep.subr.bf16.mxu1 %v1929_v5  ;;  %v1933_v8 = vld [vmem:[%s2438_s30 + $0x1e4] ss:$48 sps:$4 sm:$0xff]   ;;  %v1935_v9 = vld [vmem:[%s2438_s30 + $0x1ec] ss:$48 sps:$4 sm:$0xff]   ;;  %v1937_v10 = vld [vmem:[%s2438_s30 + $0x1e0] ss:$48 sps:$4 sm:$0xff]  }
  0x3e   : > { %v1938_v11 = vld [vmem:[%s2438_s30 + $0x1e8] ss:$48 sps:$4 sm:$0xff]   ;;  %v1939_v12 = vld [vmem:[%s2438_s30 + $0x184] ss:$48 sps:$4 sm:$0xff]   ;;  %v1941_v13 = vld [vmem:[%s2438_s30 + $0x18c] ss:$48 sps:$4 sm:$0xff]  }
  0x3f   : > { %v1943_v14 = vld [vmem:[%s2438_s30 + $0x180] ss:$48 sps:$4 sm:$0xff]   ;;  %v1944_v15 = vld [vmem:[%s2438_s30 + $0x188] ss:$48 sps:$4 sm:$0xff]   ;;  %v1945_v16 = vld [vmem:[%s2438_s30 + $0x124] ss:$48 sps:$4 sm:$0xff]  }
  0x40   : > { %1238 = vmatpush1.bf16.msra.mxu0 %v1931_v6  ;;  %1279 = vmatpush1.bf16.msra.mxu1 %v1932_v7  ;;  %v1947_v17 = vld [vmem:[%s2438_s30 + $0x12c] ss:$48 sps:$4 sm:$0xff]   ;;  %v1949_v18 = vld [vmem:[%s2438_s30 + $0x120] ss:$48 sps:$4 sm:$0xff]   ;;  %v1950_v19 = vld [vmem:[%s2438_s30 + $0x128] ss:$48 sps:$4 sm:$0xff]  }
  0x41   : > { %1239 = vmatprep.subr.bf16.mxu0 %v1933_v8  ;;  %1280 = vmatprep.subr.bf16.mxu1 %v1935_v9  ;;  %v1951_v20 = vld [vmem:[%s2438_s30 + $0xc4] ss:$48 sps:$4 sm:$0xff]   ;;  %v1953_v21 = vld [vmem:[%s2438_s30 + $0xcc] ss:$48 sps:$4 sm:$0xff]   ;;  %v1955_v22 = vld [vmem:[%s2438_s30 + $0xc0] ss:$48 sps:$4 sm:$0xff]  }
  0x42   : > { %v1956_v23 = vld [vmem:[%s2438_s30 + $0xc8] ss:$48 sps:$4 sm:$0xff]   ;;  %v1957_v24 = vld [vmem:[%s2438_s30 + $0x64] ss:$48 sps:$4 sm:$0xff]   ;;  %v1959_v25 = vld [vmem:[%s2438_s30 + $0x6c] ss:$48 sps:$4 sm:$0xff]  }
  0x43   : > { %v1961_v26 = vld [vmem:[%s2438_s30 + $0x60] ss:$48 sps:$4 sm:$0xff]   ;;  %v1962_v27 = vld [vmem:[%s2438_s30 + $0x68] ss:$48 sps:$4 sm:$0xff]   ;;  %v1963_v28 = vld [vmem:[%s2438_s30 + $0x4] ss:$48 sps:$4 sm:$0xff]  }
  0x44   : > { %1240 = vmatpush1.bf16.msra.mxu0 %v1937_v10  ;;  %1281 = vmatpush1.bf16.msra.mxu1 %v1938_v11  ;;  %v1965_v29 = vld [vmem:[%s2438_s30 + $0xc] ss:$48 sps:$4 sm:$0xff]   ;;  %v1967_v30 = vld [vmem:[%s2438_s30] ss:$48 sps:$4 sm:$0xff]   ;;  %v1968_v31 = vld [vmem:[%s2438_s30 + $0x8] ss:$48 sps:$4 sm:$0xff]  }
  0x45   : > { %1241 = vmatprep.subr.bf16.mxu0 %v1939_v12  ;;  %1282 = vmatprep.subr.bf16.mxu1 %v1941_v13  ;;  %v1969_v32 = vld [vmem:[%s2438_s30 + $0x4e4] ss:$48 sps:$4 sm:$0xff]   ;;  %v1971_v33 = vld [vmem:[%s2438_s30 + $0x4ec] ss:$48 sps:$4 sm:$0xff]   ;;  %v1973_v34 = vld [vmem:[%s2438_s30 + $0x4e0] ss:$48 sps:$4 sm:$0xff]  }
  0x46   : > { %v1974_v35 = vld [vmem:[%s2438_s30 + $0x4e8] ss:$48 sps:$4 sm:$0xff]   ;;  %v1975_v36 = vld [vmem:[%s2438_s30 + $0x484] ss:$48 sps:$4 sm:$0xff]   ;;  %v1977_v37 = vld [vmem:[%s2438_s30 + $0x48c] ss:$48 sps:$4 sm:$0xff]  }
  0x47   : > { %v1979_v38 = vld [vmem:[%s2438_s30 + $0x480] ss:$48 sps:$4 sm:$0xff]   ;;  %v1980_v39 = vld [vmem:[%s2438_s30 + $0x488] ss:$48 sps:$4 sm:$0xff]   ;;  %v1981_v40 = vld [vmem:[%s2438_s30 + $0x424] ss:$48 sps:$4 sm:$0xff]  }
  0x48   : > { %1242 = vmatpush1.bf16.msra.mxu0 %v1943_v14  ;;  %1283 = vmatpush1.bf16.msra.mxu1 %v1944_v15  ;;  %v1983_v41 = vld [vmem:[%s2438_s30 + $0x42c] ss:$48 sps:$4 sm:$0xff]   ;;  %v1985_v44 = vld [vmem:[%s2438_s30 + $0x420] ss:$48 sps:$4 sm:$0xff]   ;;  %v1986_v45 = vld [vmem:[%s2438_s30 + $0x428] ss:$48 sps:$4 sm:$0xff]  }
  0x49   : > { %1243 = vmatprep.subr.bf16.mxu0 %v1945_v16  ;;  %1284 = vmatprep.subr.bf16.mxu1 %v1947_v17  ;;  %v2487_v42 = vld.sshfl [vmem:[%s2432_s9] sm:$0x33 pattern:$0x76325410]  ;;  %v1987_v46 = vld [vmem:[%s2438_s30 + $0x3c4] ss:$48 sps:$4 sm:$0xff]  }
  0x4a   : > { %v2491_v43 = vcombine.high %v2487_v42, %v2487_v42  ;;  %v1989_v47 = vld [vmem:[%s2438_s30 + $0x3cc] ss:$48 sps:$4 sm:$0xff]   ;;  %v1991_v48 = vld [vmem:[%s2438_s30 + $0x3c0] ss:$48 sps:$4 sm:$0xff]   ;;  %v1992_v49 = vld [vmem:[%s2438_s30 + $0x3c8] ss:$48 sps:$4 sm:$0xff]  }
  0x4b   : > { %v1993_v50 = vld [vmem:[%s2438_s30 + $0x364] ss:$48 sps:$4 sm:$0xff]   ;;  %v1995_v51 = vld [vmem:[%s2438_s30 + $0x36c] ss:$48 sps:$4 sm:$0xff]   ;;  %v1997_v52 = vld [vmem:[%s2438_s30 + $0x360] ss:$48 sps:$4 sm:$0xff]  }
  0x4c   : > { %1244 = vmatpush1.bf16.msra.mxu0 %v1949_v18  ;;  %1285 = vmatpush1.bf16.msra.mxu1 %v1950_v19  ;;  %v1998_v53 = vld [vmem:[%s2438_s30 + $0x368] ss:$48 sps:$4 sm:$0xff]   ;;  %v1999_v54 = vld [vmem:[%s2438_s30 + $0x304] ss:$48 sps:$4 sm:$0xff]   ;;  %v2001_v55 = vld [vmem:[%s2438_s30 + $0x30c] ss:$48 sps:$4 sm:$0xff]  }
  0x4d   : > { %1245 = vmatprep.subr.bf16.mxu0 %v1951_v20  ;;  %1286 = vmatprep.subr.bf16.mxu1 %v1953_v21  ;;  %v2003_v56 = vld [vmem:[%s2438_s30 + $0x300] ss:$48 sps:$4 sm:$0xff]   ;;  %v2004_v57 = vld [vmem:[%s2438_s30 + $0x308] ss:$48 sps:$4 sm:$0xff]   ;;  %v2007_v58 = vld [vmem:[%s2438_s30 + $0x2b4] ss:$48 sps:$4 sm:$0xff]  }
  0x4e   : > { %1836 = vmatprep.mubr.msk.bf16.mxu0 %vm1231_vm0, %v2491_v43  ;;  %1837 = vmatprep.mubr.msk.bf16.mxu1 %vm1231_vm0, %v2491_v43  ;;  %v2010_v59 = vld [vmem:[%s2438_s30 + $0x2bc] ss:$48 sps:$4 sm:$0xff]   ;;  %v2005_v60 = vld [vmem:[%s2438_s30 + $0x2b0] ss:$48 sps:$4 sm:$0xff]   ;;  %v2008_v61 = vld [vmem:[%s2438_s30 + $0x2b8] ss:$48 sps:$4 sm:$0xff]  }
  0x4f   : > { %v2013_v62 = vld [vmem:[%s2438_s30 + $0x254] ss:$48 sps:$4 sm:$0xff]   ;;  %v2016_v63 = vld [vmem:[%s2438_s30 + $0x25c] ss:$48 sps:$4 sm:$0xff]   ;;  %v2011_v0 = vld [vmem:[%s2438_s30 + $0x250] ss:$48 sps:$4 sm:$0xff]  }
  0x50   : > { %1246 = vmatpush1.bf16.msra.mxu0 %v1955_v22  ;;  %1287 = vmatpush1.bf16.msra.mxu1 %v1956_v23  ;;  %v2014_v1 = vld [vmem:[%s2438_s30 + $0x258] ss:$48 sps:$4 sm:$0xff]   ;;  %v2019_v2 = vld [vmem:[%s2438_s30 + $0x1f4] ss:$48 sps:$4 sm:$0xff]   ;;  %v2022_v3 = vld [vmem:[%s2438_s30 + $0x1fc] ss:$48 sps:$4 sm:$0xff]  }
  0x51   : > { %1247 = vmatprep.subr.bf16.mxu0 %v1957_v24  ;;  %1288 = vmatprep.subr.bf16.mxu1 %v1959_v25  ;;  %v2017_v4 = vld [vmem:[%s2438_s30 + $0x1f0] ss:$48 sps:$4 sm:$0xff]   ;;  %v2020_v5 = vld [vmem:[%s2438_s30 + $0x1f8] ss:$48 sps:$4 sm:$0xff]   ;;  %v2025_v6 = vld [vmem:[%s2438_s30 + $0x194] ss:$48 sps:$4 sm:$0xff]  }
  0x52   : > { %v2028_v7 = vld [vmem:[%s2438_s30 + $0x19c] ss:$48 sps:$4 sm:$0xff]   ;;  %v2023_v8 = vld [vmem:[%s2438_s30 + $0x190] ss:$48 sps:$4 sm:$0xff]   ;;  %v2026_v9 = vld [vmem:[%s2438_s30 + $0x198] ss:$48 sps:$4 sm:$0xff]  }
  0x53   : > { %v2031_v10 = vld [vmem:[%s2438_s30 + $0x134] ss:$48 sps:$4 sm:$0xff]   ;;  %v2034_v11 = vld [vmem:[%s2438_s30 + $0x13c] ss:$48 sps:$4 sm:$0xff]   ;;  %v2029_v12 = vld [vmem:[%s2438_s30 + $0x130] ss:$48 sps:$4 sm:$0xff]  }
  0x54   : > { %1248 = vmatpush1.bf16.msra.mxu0 %v1961_v26  ;;  %1289 = vmatpush1.bf16.msra.mxu1 %v1962_v27  ;;  %v2032_v13 = vld [vmem:[%s2438_s30 + $0x138] ss:$48 sps:$4 sm:$0xff]   ;;  %v2037_v14 = vld [vmem:[%s2438_s30 + $0xd4] ss:$48 sps:$4 sm:$0xff]   ;;  %v2040_v15 = vld [vmem:[%s2438_s30 + $0xdc] ss:$48 sps:$4 sm:$0xff]  }
  0x55   : > { %1249 = vmatprep.subr.bf16.mxu0 %v1963_v28  ;;  %1290 = vmatprep.subr.bf16.mxu1 %v1965_v29  ;;  %v2035_v16 = vld [vmem:[%s2438_s30 + $0xd0] ss:$48 sps:$4 sm:$0xff]   ;;  %v2038_v17 = vld [vmem:[%s2438_s30 + $0xd8] ss:$48 sps:$4 sm:$0xff]   ;;  %v2043_v18 = vld [vmem:[%s2438_s30 + $0x74] ss:$48 sps:$4 sm:$0xff]  }
  0x56   : > { %v2046_v19 = vld [vmem:[%s2438_s30 + $0x7c] ss:$48 sps:$4 sm:$0xff]   ;;  %v2041_v20 = vld [vmem:[%s2438_s30 + $0x70] ss:$48 sps:$4 sm:$0xff]   ;;  %v2044_v21 = vld [vmem:[%s2438_s30 + $0x78] ss:$48 sps:$4 sm:$0xff]  }
  0x57   : > { %v2049_v22 = vld [vmem:[%s2438_s30 + $0x14] ss:$48 sps:$4 sm:$0xff]   ;;  %v2052_v23 = vld [vmem:[%s2438_s30 + $0x1c] ss:$48 sps:$4 sm:$0xff]   ;;  %v2047_v24 = vld [vmem:[%s2438_s30 + $0x10] ss:$48 sps:$4 sm:$0xff]  }
  0x58   : > { %1250 = vmatpush1.bf16.msra.mxu0 %v1967_v30  ;;  %1291 = vmatpush1.bf16.msra.mxu1 %v1968_v31  ;;  %v2050_v25 = vld [vmem:[%s2438_s30 + $0x18] ss:$48 sps:$4 sm:$0xff]   ;;  %v2055_v26 = vld [vmem:[%s2438_s30 + $0x4f4] ss:$48 sps:$4 sm:$0xff]   ;;  %v2058_v27 = vld [vmem:[%s2438_s30 + $0x4fc] ss:$48 sps:$4 sm:$0xff]  }
  0x59   : > { %1255 = vmatprep.subr.bf16.mxu0 %v1969_v32  ;;  %1296 = vmatprep.subr.bf16.mxu1 %v1971_v33  ;;  %v2053_v28 = vld [vmem:[%s2438_s30 + $0x4f0] ss:$48 sps:$4 sm:$0xff]   ;;  %v2056_v29 = vld [vmem:[%s2438_s30 + $0x4f8] ss:$48 sps:$4 sm:$0xff]   ;;  %v2061_v30 = vld [vmem:[%s2438_s30 + $0x494] ss:$48 sps:$4 sm:$0xff]  }
  0x5a   : > { %v2064_v31 = vld [vmem:[%s2438_s30 + $0x49c] ss:$48 sps:$4 sm:$0xff]   ;;  %v2059_v32 = vld [vmem:[%s2438_s30 + $0x490] ss:$48 sps:$4 sm:$0xff]   ;;  %v2062_v33 = vld [vmem:[%s2438_s30 + $0x498] ss:$48 sps:$4 sm:$0xff]  }
  0x5b   : > { %p1842_p7 = scmp.ne.s32.totalorder %s2303_s12, 0 }
  0x5c   : > { %1256 = vmatpush2.bf16.msra.mxu0 %v1973_v34  ;;  %1297 = vmatpush2.bf16.msra.mxu1 %v1974_v35  ;;  %v2067_v34 = vld [vmem:[%s2438_s30 + $0x434] ss:$48 sps:$4 sm:$0xff]   ;;  %v2070_v35 = vld [vmem:[%s2438_s30 + $0x43c] ss:$48 sps:$4 sm:$0xff]  }
  0x5d   : > { %1257 = vmatprep.subr.bf16.mxu0 %v1975_v36  ;;  %1298 = vmatprep.subr.bf16.mxu1 %v1977_v37  ;;  %v2065_v36 = vld [vmem:[%s2438_s30 + $0x430] ss:$48 sps:$4 sm:$0xff]   ;;  %v2068_v37 = vld [vmem:[%s2438_s30 + $0x438] ss:$48 sps:$4 sm:$0xff]  }
  0x60   : > { %1258 = vmatpush2.bf16.msra.mxu0 %v1979_v38  ;;  %1299 = vmatpush2.bf16.msra.mxu1 %v1980_v39  ;;  %v2073_v38 = vld [vmem:[%s2438_s30 + $0x3d4] ss:$48 sps:$4 sm:$0xff]   ;;  %v2076_v39 = vld [vmem:[%s2438_s30 + $0x3dc] ss:$48 sps:$4 sm:$0xff]  }
  0x61   : > { %1259 = vmatprep.subr.bf16.mxu0 %v1981_v40  ;;  %1300 = vmatprep.subr.bf16.mxu1 %v1983_v41  ;;  %v2071_v40 = vld [vmem:[%s2438_s30 + $0x3d0] ss:$48 sps:$4 sm:$0xff]   ;;  %v2074_v41 = vld [vmem:[%s2438_s30 + $0x3d8] ss:$48 sps:$4 sm:$0xff]  }
  0x64   : > { %1260 = vmatpush2.bf16.msra.mxu0 %v1985_v44  ;;  %1301 = vmatpush2.bf16.msra.mxu1 %v1986_v45  ;;  %v2079_v44 = vld [vmem:[%s2438_s30 + $0x374] ss:$48 sps:$4 sm:$0xff]   ;;  %v2082_v45 = vld [vmem:[%s2438_s30 + $0x37c] ss:$48 sps:$4 sm:$0xff]  }
  0x65   : > { %1261 = vmatprep.subr.bf16.mxu0 %v1987_v46  ;;  %1302 = vmatprep.subr.bf16.mxu1 %v1989_v47  ;;  %v2077_v46 = vld [vmem:[%s2438_s30 + $0x370] ss:$48 sps:$4 sm:$0xff]   ;;  %v2080_v47 = vld [vmem:[%s2438_s30 + $0x378] ss:$48 sps:$4 sm:$0xff]  }
  0x68   : > { %1262 = vmatpush2.bf16.msra.mxu0 %v1991_v48  ;;  %1303 = vmatpush2.bf16.msra.mxu1 %v1992_v49  ;;  %v2085_v48 = vld [vmem:[%s2438_s30 + $0x314] ss:$48 sps:$4 sm:$0xff]   ;;  %v2088_v49 = vld [vmem:[%s2438_s30 + $0x31c] ss:$48 sps:$4 sm:$0xff]  }
  0x69   : > { %1263 = vmatprep.subr.bf16.mxu0 %v1993_v50  ;;  %1304 = vmatprep.subr.bf16.mxu1 %v1995_v51  ;;  %v2083_v50 = vld [vmem:[%s2438_s30 + $0x310] ss:$48 sps:$4 sm:$0xff]   ;;  %v2086_v51 = vld [vmem:[%s2438_s30 + $0x318] ss:$48 sps:$4 sm:$0xff]  }
  0x6c   : > { %1264 = vmatpush2.bf16.msra.mxu0 %v1997_v52  ;;  %1305 = vmatpush2.bf16.msra.mxu1 %v1998_v53  ;;  %v2091_v52 = vld [vmem:[%s2438_s30 + $0x2c4] ss:$48 sps:$4 sm:$0xff]   ;;  %v2094_v53 = vld [vmem:[%s2438_s30 + $0x2cc] ss:$48 sps:$4 sm:$0xff]  }
  0x6d   : > { %1265 = vmatprep.subr.bf16.mxu0 %v1999_v54  ;;  %1306 = vmatprep.subr.bf16.mxu1 %v2001_v55  ;;  %v2089_v54 = vld [vmem:[%s2438_s30 + $0x2c0] ss:$48 sps:$4 sm:$0xff]   ;;  %v2092_v55 = vld [vmem:[%s2438_s30 + $0x2c8] ss:$48 sps:$4 sm:$0xff]  }
  0x70   : > { %1266 = vmatpush2.bf16.msra.mxu0 %v2003_v56  ;;  %1307 = vmatpush2.bf16.msra.mxu1 %v2004_v57  ;;  %v2097_v56 = vld [vmem:[%s2438_s30 + $0x264] ss:$48 sps:$4 sm:$0xff]   ;;  %v2100_v57 = vld [vmem:[%s2438_s30 + $0x26c] ss:$48 sps:$4 sm:$0xff]  }
  0x71   : > { %1317 = vmatprep.subr.bf16.mxu0 %v2007_v58  ;;  %1358 = vmatprep.subr.bf16.mxu1 %v2010_v59  ;;  %v2095_v58 = vld [vmem:[%s2438_s30 + $0x260] ss:$48 sps:$4 sm:$0xff]   ;;  %v2098_v59 = vld [vmem:[%s2438_s30 + $0x268] ss:$48 sps:$4 sm:$0xff]  }
  0x73   : > { %1268 = vmatmul.mubr.bf16.vlgmr.msra.gmra.mxu0 %v2487_v42  ;;  %1309 = vmatmul.mubr.bf16.vlgmr.msra.gmra.mxu1 %v2487_v42 }
  0x74   : > { %1318 = vmatpush1.bf16.msra.mxu0 %v2005_v60  ;;  %1359 = vmatpush1.bf16.msra.mxu1 %v2008_v61  ;;  %v2103_v60 = vld [vmem:[%s2438_s30 + $0x204] ss:$48 sps:$4 sm:$0xff]   ;;  %v2106_v61 = vld [vmem:[%s2438_s30 + $0x20c] ss:$48 sps:$4 sm:$0xff]  }
  0x75   : > { %1319 = vmatprep.subr.bf16.mxu0 %v2013_v62  ;;  %1360 = vmatprep.subr.bf16.mxu1 %v2016_v63  ;;  %v2101_v62 = vld [vmem:[%s2438_s30 + $0x200] ss:$48 sps:$4 sm:$0xff]   ;;  %v2104_v63 = vld [vmem:[%s2438_s30 + $0x208] ss:$48 sps:$4 sm:$0xff]  }
  0x76   : > { %1838 = vmatprep.mubr.msk.bf16.mxu0 %vm1231_vm0, %v2491_v43  ;;  %1839 = vmatprep.mubr.msk.bf16.mxu1 %vm1231_vm0, %v2491_v43 }
  0x78   : > { %1320 = vmatpush1.bf16.msra.mxu0 %v2011_v0  ;;  %1361 = vmatpush1.bf16.msra.mxu1 %v2014_v1  ;;  %v2109_v0 = vld [vmem:[%s2438_s30 + $0x1a4] ss:$48 sps:$4 sm:$0xff]   ;;  %v2112_v1 = vld [vmem:[%s2438_s30 + $0x1ac] ss:$48 sps:$4 sm:$0xff]  }
  0x79   : > { %1321 = vmatprep.subr.bf16.mxu0 %v2019_v2  ;;  %1362 = vmatprep.subr.bf16.mxu1 %v2022_v3  ;;  %v2107_v2 = vld [vmem:[%s2438_s30 + $0x1a0] ss:$48 sps:$4 sm:$0xff]   ;;  %v2110_v3 = vld [vmem:[%s2438_s30 + $0x1a8] ss:$48 sps:$4 sm:$0xff]  }
  0x7c   : > { %1322 = vmatpush1.bf16.msra.mxu0 %v2017_v4  ;;  %1363 = vmatpush1.bf16.msra.mxu1 %v2020_v5  ;;  %v2118_v4 = vld [vmem:[%s2438_s30 + $0x14c] ss:$48 sps:$4 sm:$0xff]   ;;  %v2113_v5 = vld [vmem:[%s2438_s30 + $0x140] ss:$48 sps:$4 sm:$0xff]  }
  0x7d   : > { %1323 = vmatprep.subr.bf16.mxu0 %v2025_v6  ;;  %1364 = vmatprep.subr.bf16.mxu1 %v2028_v7  ;;  %v2116_v6 = vld [vmem:[%s2438_s30 + $0x148] ss:$48 sps:$4 sm:$0xff]   ;;  %v2121_v7 = vld [vmem:[%s2438_s30 + $0xe4] ss:$48 sps:$4 sm:$0xff]  }
  0x80   : > { %1324 = vmatpush1.bf16.msra.mxu0 %v2023_v8  ;;  %1365 = vmatpush1.bf16.msra.mxu1 %v2026_v9  ;;  %v2124_v8 = vld [vmem:[%s2438_s30 + $0xec] ss:$48 sps:$4 sm:$0xff]   ;;  %v2119_v9 = vld [vmem:[%s2438_s30 + $0xe0] ss:$48 sps:$4 sm:$0xff]  }
  0x81   : > { %1325 = vmatprep.subr.bf16.mxu0 %v2031_v10  ;;  %1366 = vmatprep.subr.bf16.mxu1 %v2034_v11  ;;  %v2122_v10 = vld [vmem:[%s2438_s30 + $0xe8] ss:$48 sps:$4 sm:$0xff]   ;;  %v2127_v11 = vld [vmem:[%s2438_s30 + $0x84] ss:$48 sps:$4 sm:$0xff]  }
  0x84   : > { %1326 = vmatpush1.bf16.msra.mxu0 %v2029_v12  ;;  %1367 = vmatpush1.bf16.msra.mxu1 %v2032_v13  ;;  %v2130_v12 = vld [vmem:[%s2438_s30 + $0x8c] ss:$48 sps:$4 sm:$0xff]   ;;  %v2125_v13 = vld [vmem:[%s2438_s30 + $0x80] ss:$48 sps:$4 sm:$0xff]  }
  0x85   : > { %1327 = vmatprep.subr.bf16.mxu0 %v2037_v14  ;;  %1368 = vmatprep.subr.bf16.mxu1 %v2040_v15  ;;  %v2128_v14 = vld [vmem:[%s2438_s30 + $0x88] ss:$48 sps:$4 sm:$0xff]   ;;  %v2133_v15 = vld [vmem:[%s2438_s30 + $0x24] ss:$48 sps:$4 sm:$0xff]  }
  0x88   : > { %1328 = vmatpush1.bf16.msra.mxu0 %v2035_v16  ;;  %1369 = vmatpush1.bf16.msra.mxu1 %v2038_v17  ;;  %v2136_v16 = vld [vmem:[%s2438_s30 + $0x2c] ss:$48 sps:$4 sm:$0xff]   ;;  %v2131_v17 = vld [vmem:[%s2438_s30 + $0x20] ss:$48 sps:$4 sm:$0xff]  }
  0x89   : > { %1329 = vmatprep.subr.bf16.mxu0 %v2043_v18  ;;  %1370 = vmatprep.subr.bf16.mxu1 %v2046_v19  ;;  %v2134_v18 = vld [vmem:[%s2438_s30 + $0x28] ss:$48 sps:$4 sm:$0xff]   ;;  %v2139_v19 = vld [vmem:[%s2438_s30 + $0x504] ss:$48 sps:$4 sm:$0xff]  }
  0x8c   : > { %1330 = vmatpush1.bf16.msra.mxu0 %v2041_v20  ;;  %1371 = vmatpush1.bf16.msra.mxu1 %v2044_v21  ;;  %v2142_v20 = vld [vmem:[%s2438_s30 + $0x50c] ss:$48 sps:$4 sm:$0xff]   ;;  %v2137_v21 = vld [vmem:[%s2438_s30 + $0x500] ss:$48 sps:$4 sm:$0xff]  }
  0x8d   : > { %1331 = vmatprep.subr.bf16.mxu0 %v2049_v22  ;;  %1372 = vmatprep.subr.bf16.mxu1 %v2052_v23  ;;  %v2140_v22 = vld [vmem:[%s2438_s30 + $0x508] ss:$48 sps:$4 sm:$0xff]   ;;  %v2145_v23 = vld [vmem:[%s2438_s30 + $0x4a4] ss:$48 sps:$4 sm:$0xff]  }
  0x90   : > { %1332 = vmatpush1.bf16.msra.mxu0 %v2047_v24  ;;  %1373 = vmatpush1.bf16.msra.mxu1 %v2050_v25  ;;  %v2148_v24 = vld [vmem:[%s2438_s30 + $0x4ac] ss:$48 sps:$4 sm:$0xff]   ;;  %v2143_v25 = vld [vmem:[%s2438_s30 + $0x4a0] ss:$48 sps:$4 sm:$0xff]  }
  0x91   : > { %1337 = vmatprep.subr.bf16.mxu0 %v2055_v26  ;;  %1378 = vmatprep.subr.bf16.mxu1 %v2058_v27  ;;  %v2146_v26 = vld [vmem:[%s2438_s30 + $0x4a8] ss:$48 sps:$4 sm:$0xff]   ;;  %v2151_v27 = vld [vmem:[%s2438_s30 + $0x444] ss:$48 sps:$4 sm:$0xff]  }
  0x94   : > { %1338 = vmatpush2.bf16.msra.mxu0 %v2053_v28  ;;  %1379 = vmatpush2.bf16.msra.mxu1 %v2056_v29  ;;  %v2154_v28 = vld [vmem:[%s2438_s30 + $0x44c] ss:$48 sps:$4 sm:$0xff]   ;;  %v2149_v29 = vld [vmem:[%s2438_s30 + $0x440] ss:$48 sps:$4 sm:$0xff]  }
  0x95   : > { %1339 = vmatprep.subr.bf16.mxu0 %v2061_v30  ;;  %1380 = vmatprep.subr.bf16.mxu1 %v2064_v31  ;;  %v2152_v30 = vld [vmem:[%s2438_s30 + $0x448] ss:$48 sps:$4 sm:$0xff]   ;;  %v2157_v31 = vld [vmem:[%s2438_s30 + $0x3e4] ss:$48 sps:$4 sm:$0xff]  }
  0x98   : > { %1340 = vmatpush2.bf16.msra.mxu0 %v2059_v32  ;;  %1381 = vmatpush2.bf16.msra.mxu1 %v2062_v33  ;;  %v2160_v32 = vld [vmem:[%s2438_s30 + $0x3ec] ss:$48 sps:$4 sm:$0xff]   ;;  %v2155_v33 = vld [vmem:[%s2438_s30 + $0x3e0] ss:$48 sps:$4 sm:$0xff]  }
  0x99   : > { %1341 = vmatprep.subr.bf16.mxu0 %v2067_v34  ;;  %1382 = vmatprep.subr.bf16.mxu1 %v2070_v35  ;;  %v2158_v34 = vld [vmem:[%s2438_s30 + $0x3e8] ss:$48 sps:$4 sm:$0xff]   ;;  %v2163_v35 = vld [vmem:[%s2438_s30 + $0x384] ss:$48 sps:$4 sm:$0xff]  }
  0x9c   : > { %1342 = vmatpush2.bf16.msra.mxu0 %v2065_v36  ;;  %1383 = vmatpush2.bf16.msra.mxu1 %v2068_v37  ;;  %v2166_v36 = vld [vmem:[%s2438_s30 + $0x38c] ss:$48 sps:$4 sm:$0xff]   ;;  %v2161_v37 = vld [vmem:[%s2438_s30 + $0x380] ss:$48 sps:$4 sm:$0xff]  }
  0x9d   : > { %1343 = vmatprep.subr.bf16.mxu0 %v2073_v38  ;;  %1384 = vmatprep.subr.bf16.mxu1 %v2076_v39  ;;  %v2164_v38 = vld [vmem:[%s2438_s30 + $0x388] ss:$48 sps:$4 sm:$0xff]   ;;  %v2169_v39 = vld [vmem:[%s2438_s30 + $0x324] ss:$48 sps:$4 sm:$0xff]  }
  0xa0   : > { %1344 = vmatpush2.bf16.msra.mxu0 %v2071_v40  ;;  %1385 = vmatpush2.bf16.msra.mxu1 %v2074_v41  ;;  %v2172_v40 = vld [vmem:[%s2438_s30 + $0x32c] ss:$48 sps:$4 sm:$0xff]   ;;  %v2167_v41 = vld [vmem:[%s2438_s30 + $0x320] ss:$48 sps:$4 sm:$0xff]  }
  0xa1   : > { %1345 = vmatprep.subr.bf16.mxu0 %v2079_v44  ;;  %1386 = vmatprep.subr.bf16.mxu1 %v2082_v45  ;;  %v2170_v44 = vld [vmem:[%s2438_s30 + $0x328] ss:$48 sps:$4 sm:$0xff]  }
  0xa4   : > { %1346 = vmatpush2.bf16.msra.mxu0 %v2077_v46  ;;  %1387 = vmatpush2.bf16.msra.mxu1 %v2080_v47 }
  0xa5   : > { %1347 = vmatprep.subr.bf16.mxu0 %v2085_v48  ;;  %1388 = vmatprep.subr.bf16.mxu1 %v2088_v49 }
  0xa8   : > { %1348 = vmatpush2.bf16.msra.mxu0 %v2083_v50  ;;  %1389 = vmatpush2.bf16.msra.mxu1 %v2086_v51 }
  0xa9   : > { %1399 = vmatprep.subr.bf16.mxu0 %v2091_v52  ;;  %1440 = vmatprep.subr.bf16.mxu1 %v2094_v53 }
  0xab   : > { %1350 = vmatmul.mubr.bf16.vlgmr.msra.gmra.mxu0 %v2487_v42  ;;  %1391 = vmatmul.mubr.bf16.vlgmr.msra.gmra.mxu1 %v2487_v42 }
  0xac   : > { %1400 = vmatpush1.bf16.msra.mxu0 %v2089_v54  ;;  %1441 = vmatpush1.bf16.msra.mxu1 %v2092_v55 }
  0xad   : > { %1401 = vmatprep.subr.bf16.mxu0 %v2097_v56  ;;  %1442 = vmatprep.subr.bf16.mxu1 %v2100_v57 }
  0xae   : > { %1840 = vmatprep.mubr.msk.bf16.mxu0 %vm1231_vm0, %v2491_v43  ;;  %1841 = vmatprep.mubr.msk.bf16.mxu1 %vm1231_vm0, %v2491_v43  ;;  %v2115_v43 = vld [vmem:[%s2438_s30 + $0x144] ss:$48 sps:$4 sm:$0xff]  }
  0xb0   : > { %1402 = vmatpush1.bf16.msra.mxu0 %v2095_v58  ;;  %1443 = vmatpush1.bf16.msra.mxu1 %v2098_v59 }
  0xb1   : > { %1403 = vmatprep.subr.bf16.mxu0 %v2103_v60  ;;  %1444 = vmatprep.subr.bf16.mxu1 %v2106_v61 }
  0xb4   : > { %1404 = vmatpush1.bf16.msra.mxu0 %v2101_v62  ;;  %1445 = vmatpush1.bf16.msra.mxu1 %v2104_v63 }
  0xb5   : > { %1405 = vmatprep.subr.bf16.mxu0 %v2109_v0  ;;  %1446 = vmatprep.subr.bf16.mxu1 %v2112_v1 }
  0xb8   : > { %1406 = vmatpush1.bf16.msra.mxu0 %v2107_v2  ;;  %1447 = vmatpush1.bf16.msra.mxu1 %v2110_v3 }
  0xb9   : > { %1407 = vmatprep.subr.bf16.mxu0 %v2115_v43  ;;  %1448 = vmatprep.subr.bf16.mxu1 %v2118_v4 }
  0xbc   : > { %1408 = vmatpush1.bf16.msra.mxu0 %v2113_v5  ;;  %1449 = vmatpush1.bf16.msra.mxu1 %v2116_v6 }
  0xbd   : > { %1409 = vmatprep.subr.bf16.mxu0 %v2121_v7  ;;  %1450 = vmatprep.subr.bf16.mxu1 %v2124_v8 }
  0xc0   : > { %1410 = vmatpush1.bf16.msra.mxu0 %v2119_v9  ;;  %1451 = vmatpush1.bf16.msra.mxu1 %v2122_v10 }
  0xc1   : > { %1411 = vmatprep.subr.bf16.mxu0 %v2127_v11  ;;  %1452 = vmatprep.subr.bf16.mxu1 %v2130_v12 }
  0xc4   : > { %1412 = vmatpush1.bf16.msra.mxu0 %v2125_v13  ;;  %1453 = vmatpush1.bf16.msra.mxu1 %v2128_v14 }
  0xc5   : > { %1413 = vmatprep.subr.bf16.mxu0 %v2133_v15  ;;  %1454 = vmatprep.subr.bf16.mxu1 %v2136_v16 }
  0xc8   : > { %1414 = vmatpush1.bf16.msra.mxu0 %v2131_v17  ;;  %1455 = vmatpush1.bf16.msra.mxu1 %v2134_v18 }
  0xc9   : > { %1419 = vmatprep.subr.bf16.mxu0 %v2139_v19  ;;  %1460 = vmatprep.subr.bf16.mxu1 %v2142_v20 }
  0xcc   : > { %1420 = vmatpush2.bf16.msra.mxu0 %v2137_v21  ;;  %1461 = vmatpush2.bf16.msra.mxu1 %v2140_v22 }
  0xcd   : > { %1421 = vmatprep.subr.bf16.mxu0 %v2145_v23  ;;  %1462 = vmatprep.subr.bf16.mxu1 %v2148_v24 }
  0xd0   : > { %1422 = vmatpush2.bf16.msra.mxu0 %v2143_v25  ;;  %1463 = vmatpush2.bf16.msra.mxu1 %v2146_v26 }
  0xd1   : > { %1423 = vmatprep.subr.bf16.mxu0 %v2151_v27  ;;  %1464 = vmatprep.subr.bf16.mxu1 %v2154_v28 }
  0xd4   : > { %1424 = vmatpush2.bf16.msra.mxu0 %v2149_v29  ;;  %1465 = vmatpush2.bf16.msra.mxu1 %v2152_v30 }
  0xd5   : > { %1425 = vmatprep.subr.bf16.mxu0 %v2157_v31  ;;  %1466 = vmatprep.subr.bf16.mxu1 %v2160_v32 }
  0xd8   : > { %1426 = vmatpush2.bf16.msra.mxu0 %v2155_v33  ;;  %1467 = vmatpush2.bf16.msra.mxu1 %v2158_v34 }
  0xd9   : > { %1427 = vmatprep.subr.bf16.mxu0 %v2163_v35  ;;  %1468 = vmatprep.subr.bf16.mxu1 %v2166_v36 }
  0xdc   : > { %1428 = vmatpush2.bf16.msra.mxu0 %v2161_v37  ;;  %1469 = vmatpush2.bf16.msra.mxu1 %v2164_v38 }
  0xdd   : > { %1429 = vmatprep.subr.bf16.mxu0 %v2169_v39  ;;  %1470 = vmatprep.subr.bf16.mxu1 %v2172_v40 }
  0xe0   : > { %1430 = vmatpush2.bf16.msra.mxu0 %v2167_v41  ;;  %1471 = vmatpush2.bf16.msra.mxu1 %v2170_v44 }
  0xe3   : > { %1432 = vmatmul.mubr.bf16.vlgmr.msra.gmra.mxu0 %v2487_v42  ;;  %1473 = vmatmul.mubr.bf16.vlgmr.msra.gmra.mxu1 %v2487_v42 }
 0x133   : > { %v1269_v45 = vpop.f32.mrf.mxu0  ;;  %v1310_v46 = vpop.f32.mrf.mxu1 }
 0x135   : > { %v1271_v47 = vpop.f32.mrf.mxu0  ;;  %v1312_v48 = vpop.f32.mrf.mxu1 }
 0x137   : > { %v1273_v49 = vpop.f32.mrf.mxu0  ;;  %v1314_v50 = vpop.f32.mrf.mxu1 }
 0x139   : > { %v1274_v51 = vpop.f32.mrf.mxu0  ;;  %v1315_v52 = vpop.f32.mrf.mxu1 }
 0x16b   : > { %v1351_v53 = vpop.f32.mrf.mxu0  ;;  %v1392_v54 = vpop.f32.mrf.mxu1 }
 0x16d   : > { %v1353_v55 = vpop.f32.mrf.mxu0  ;;  %v1394_v56 = vpop.f32.mrf.mxu1 }
 0x16f   : > { %v1355_v57 = vpop.f32.mrf.mxu0  ;;  %v1396_v58 = vpop.f32.mrf.mxu1 }
 0x171   : > { %v1356_v59 = vpop.f32.mrf.mxu0  ;;  %v1397_v60 = vpop.f32.mrf.mxu1 }
 0x1a3   : > { %v1433_v61 = vpop.f32.mrf.mxu0  ;;  %v1474_v62 = vpop.f32.mrf.mxu1 }
 0x1a5   : > { %v1435_v63 = vpop.f32.mrf.mxu0  ;;  %v1476_v42 = vpop.f32.mrf.mxu1  ;;  %1484 = sbr.rel (%p1842_p7) target bundleno = 431 (0x1af), region = 40 }
 0x1a7   : > { %v1437_v0 = vpop.f32.mrf.mxu0  ;;  %v1478_v1 = vpop.f32.mrf.mxu1 }
 0x1a9   : > { %v1438_v2 = vpop.f32.mrf.mxu0  ;;  %v1479_v3 = vpop.f32.mrf.mxu1 }
 0x1aa   : > { %v1497_v43 = vcombine.low %v1269_v45, %v1271_v47  ;;  %v1498_v4 = vcombine.low %v1310_v46, %v1312_v48  ;;  %v1499_v5 = vcombine.low %v1351_v53, %v1353_v55  ;;  %v1500_v6 = vcombine.low %v1392_v54, %v1394_v56 }
 0x1ab   : > { %v1501_v7 = vcombine.low %v1433_v61, %v1435_v63  ;;  %v1502_v8 = vcombine.low %v1474_v62, %v1476_v42 }
 0x1ac   : > { %1509 = vst [vmem:[#allocation7] sm:$0xff] %v1497_v43  ;;  %1510 = vst [vmem:[#allocation7 + $0x8] sm:$0xff] %v1498_v4 }
 0x1ad   : > { %1511 = vst [vmem:[#allocation7 + $0x10] sm:$0xff] %v1499_v5  ;;  %1512 = vst [vmem:[#allocation7 + $0x18] sm:$0xff] %v1500_v6 }
 0x1ae   : > { %1513 = vst [vmem:[#allocation7 + $0x20] sm:$0xff] %v1501_v7  ;;  %1514 = vst [vmem:[#allocation7 + $0x28] sm:$0xff] %v1502_v8 }
 0x1af PF: > { %p1843_p9 = scmp.le.s32.totalorder %s2303_s12, 0 }
 0x1b1   : > { %1518 = sbr.rel (%p1843_p9) target bundleno = 445 (0x1bd), region = 44 }
 0x1b6   : > { %v1519_v9 = vld [vmem:[#allocation7] sm:$0xff]  ;;  %v1537_v10 = vcombine.low %v1269_v45, %v1271_v47  ;;  %v1520_v11 = vld [vmem:[#allocation7 + $0x8] sm:$0xff]  ;;  %v1538_v12 = vcombine.low %v1310_v46, %v1312_v48  ;;  %v1521_v13 = vld [vmem:[#allocation7 + $0x10] sm:$0xff]  ;;  %v1539_v14 = vcombine.low %v1351_v53, %v1353_v55  ;;  %v1540_v15 = vcombine.low %v1392_v54, %v1394_v56 }
 0x1b7   : > { %v1522_v16 = vld [vmem:[#allocation7 + $0x18] sm:$0xff]  ;;  %v1523_v17 = vld [vmem:[#allocation7 + $0x20] sm:$0xff]  ;;  %v1541_v18 = vcombine.low %v1433_v61, %v1435_v63  ;;  %v1524_v19 = vld [vmem:[#allocation7 + $0x28] sm:$0xff]  ;;  %v1542_v20 = vcombine.low %v1474_v62, %v1476_v42 }
 0x1b8   : > { %v1549_v21 = vadd.f32 %v1537_v10, %v1519_v9  ;;  %v1550_v22 = vadd.f32 %v1538_v12, %v1520_v11  ;;  %v1551_v23 = vadd.f32 %v1539_v14, %v1521_v13  ;;  %v1552_v24 = vadd.f32 %v1540_v15, %v1522_v16 }
 0x1b9   : > { %v1553_v25 = vadd.f32 %v1541_v18, %v1523_v17  ;;  %v1554_v26 = vadd.f32 %v1542_v20, %v1524_v19 }
 0x1ba   : > { %1555 = vst [vmem:[#allocation7] sm:$0xff] %v1549_v21  ;;  %1556 = vst [vmem:[#allocation7 + $0x8] sm:$0xff] %v1550_v22 }
 0x1bb   : > { %1557 = vst [vmem:[#allocation7 + $0x10] sm:$0xff] %v1551_v23  ;;  %1558 = vst [vmem:[#allocation7 + $0x18] sm:$0xff] %v1552_v24 }
 0x1bc   : > { %1559 = vst [vmem:[#allocation7 + $0x20] sm:$0xff] %v1553_v25  ;;  %1560 = vst [vmem:[#allocation7 + $0x28] sm:$0xff] %v1554_v26 }
 0x1bd PF: > { %p2641_p12 = scmp.eq.s32.totalorder %s1658_s15, 2  ;;  %s2317_s20 = smov [#allocation7]  }
 0x1be   : > { %s1571_s8 = sshll.u32 %s2317_s20, 4  ;;  %s1572_s8 = int_to_ptr.vmem [resolvable:$true] %s1571_s8 }
 0x1bf   : > { %s2229_s19 = scalar_lea.vmem %s1572_s8, 768  ;;  %p2236_p6 = scmp.lt.s32.totalorder %s1572_s8, %s1572_s8 }
 0x1c0   : > { %p2230_p3 = scmp.ne.s32.totalorder %s1572_s8, %s2229_s19  ;;  %p2237_p8 = scmp.lt.s32.totalorder %s2229_s19, %s2229_s19 }
 0x1c2   : > { %p2231_p4 = pnand %p2230_p3, %p2641_p12  ;;  %p2238_p13 = por %p2237_p8, %p2236_p6 }
 0x1c4   : > { %p2232_p5 = pneg %p2231_p4 }
 0x1c6   : > { %p2239_p0 = pnand %p2238_p13, %p2232_p5 }
 0x1c8   : > { %2242 = shalt.err (!%p2239_p0)
}
 0x1c9   : > { %1857 = dma.vmem_to_hbm [thread:$0]  (%p2641_p12), %s1572_s8, 768, %s2676_s2, [#allocation4]  }
 0x1ca   : > { %2286 = dma.done.wait (%p2641_p12), [#allocation4], 768  }
 0x1cb   : > { %2288 = vsyncadd (%p2641_p12), [#allocation4], 4294966528 }
 0x1cc PF: > { %s19_s14 = sadd.s32 1, %s2311_s14   ;;  %s2682_s9 = smov %s2295_s10 }
 0x1cd   : > { %p16_p10 = scmp.ge.s32.totalorder %s19_s14, 5   ;;  %s2683_s10 = smov %s2299_s11 }
 0x1ce   : > { %s2684_s11 = smov %s2384_s21  ;;  %s2685_s12 = smov %s2307_s13 }
 0x1cf   : > { %s2686_s13 = smov %s2688_s16  ;;  %18 = sbr.rel (!%p16_p10) target bundleno = 7 (0x7), region = 87 }
 0x1d4   :  { %1584 = vsyncpa [#allocation3], 1 }
 0x1d5   :  { %1586 = vsyncpa [#allocation3 + $0x1], 1 }
 0x1d6   :  { %1587 = vsyncpa [#allocation6], 1 }
 0x1d7   :  { %1589 = vsyncpa [#allocation6 + $0x1], 1 }
 0x1d8   :  { %1590 = vsyncpa [#allocation4], 1 }
 0x1d9   :  { %1592 = vsyncpa [#allocation4 + $0x1], 1 }

</bundles_post_ra>
